<compile_context>
chip_gen: v6e
topology: v6e:2x2x1
jax: 0.10.0
libtpu: 0.0.40
codegen_flags: <defaults>
</compile_context>

<pallas_src>
import functools

import jax
import jax.numpy as jnp
import numpy as np
from jax.experimental import pallas as pl
from jax.experimental.pallas import tpu as pltpu

HIDDEN = 32   # args.hidden_size
VOCAB = 16    # input_size (vocabulary)


def gru_encoder_kernel(tok_ref, emb_ref, h0_ref, w_ref, b_ref,
                       out_ref, h_scr, *, hidden_size):
    """One GRU step per grid iteration; whole sequence in a single pallas_call.

    emb_ref : (1, 1, H)  -- embedding row of token[t] (picked via scalar prefetch)
    h0_ref  : (1, H)     -- initial hidden state (only read at t == 0)
    w_ref   : (2H, 4H)   -- fused gate weights, columns [r | z | gi_n | gh_n],
                            rows [x-part (W_ih^T) ; h-part (W_hh^T)]
    b_ref   : (1, 4H)    -- fused biases [b_ih_r+b_hh_r, b_ih_z+b_hh_z, b_ih_n, b_hh_n]
    out_ref : (1, 1, H)  -- per-step GRU output (row t of the sequence output)
    h_scr   : (1, H)     -- VMEM-resident hidden-state carry across grid steps
    """
    del tok_ref  # only consumed by the embedding index_map
    H = hidden_size
    t = pl.program_id(0)

    @pl.when(t == 0)
    def _():
        h_scr[...] = h0_ref[...]

    x = emb_ref[0]                                   # (1, H)
    h = h_scr[...]                                   # (1, H)
    xh = jnp.concatenate([x, h], axis=-1)            # (1, 2H)

    # Single fused MXU matmul for all gates (one push/pop instead of two).
    g = jnp.dot(xh, w_ref[...], preferred_element_type=jnp.float32) + b_ref[...]

    r = jax.nn.sigmoid(g[:, 0:H])
    z = jax.nn.sigmoid(g[:, H:2 * H])
    n = jnp.tanh(g[:, 2 * H:3 * H] + r * g[:, 3 * H:4 * H])
    h_new = (1.0 - z) * n + z * h

    h_scr[...] = h_new
    out_ref[0] = h_new.astype(out_ref.dtype)


def prepare_params(emb_table, w_ih, w_hh, b_ih, b_hh):
    """One-time (outside jit) parameter re-layout.

    PyTorch GRU weights: w_ih, w_hh are (3H, H), gate order [r, z, n].
    Produces:
      emb3    : (V, 1, H)    embedding table, ready for (1,1,H) row blocks
      w_fused : (2H, 4H)     [x;h] @ w_fused = [pre_r, pre_z, gi_n, gh_n]
      b_fused : (1, 4H)
    """
    H = emb_table.shape[1]
    wih_t = w_ih.T                                   # (H, 3H), cols [r, z, n]
    whh_t = w_hh.T                                   # (H, 3H)

    w_fused = jnp.zeros((2 * H, 4 * H), dtype=jnp.float32)
    w_fused = w_fused.at[:H, 0:2 * H].set(wih_t[:, 0:2 * H])        # r,z from x
    w_fused = w_fused.at[H:, 0:2 * H].set(whh_t[:, 0:2 * H])        # r,z from h
    w_fused = w_fused.at[:H, 2 * H:3 * H].set(wih_t[:, 2 * H:3 * H])  # gi_n
    w_fused = w_fused.at[H:, 3 * H:4 * H].set(whh_t[:, 2 * H:3 * H])  # gh_n

    b_fused = jnp.concatenate([
        b_ih[0:2 * H] + b_hh[0:2 * H],               # r, z biases folded
        b_ih[2 * H:3 * H],                           # n gate: input bias
        b_hh[2 * H:3 * H],                           # n gate: hidden bias
    ]).reshape(1, 4 * H)

    emb3 = emb_table.reshape(emb_table.shape[0], 1, H)
    return emb3, w_fused, b_fused


@jax.jit
def encoder_forward(tokens, hidden, emb3, w_fused, b_fused):
    """Runs Encoder.forward for every token in `tokens` in ONE pallas_call.

    tokens  : int32[S]          (S == 1 reproduces the module forward exactly)
    hidden  : f32[1, 1, H]      initial hidden state
    returns : (outputs f32[S,1,H], final hidden f32[1,1,H])
    """
    S = tokens.shape[0]
    H = emb3.shape[-1]
    h0 = hidden.reshape(1, H)

    grid_spec = pltpu.PrefetchScalarGridSpec(
        num_scalar_prefetch=1,
        grid=(S,),
        in_specs=[
            # embedding row of token[t], chosen with the prefetched scalars
            pl.BlockSpec((1, 1, H), lambda t, tok: (tok[t], 0, 0)),
            pl.BlockSpec((1, H), lambda t, tok: (0, 0)),             # h0 (resident)
            pl.BlockSpec((2 * H, 4 * H), lambda t, tok: (0, 0)),     # fused W (resident)
            pl.BlockSpec((1, 4 * H), lambda t, tok: (0, 0)),         # fused b (resident)
        ],
        out_specs=pl.BlockSpec((1, 1, H), lambda t, tok: (t, 0, 0)),
        scratch_shapes=[pltpu.VMEM((1, H), jnp.float32)],            # hidden carry
    )

    outputs = pl.pallas_call(
        functools.partial(gru_encoder_kernel, hidden_size=H),
        out_shape=jax.ShapeDtypeStruct((S, 1, H), jnp.float32),
        grid_spec=grid_spec,
        compiler_params=pltpu.CompilerParams(
            dimension_semantics=("arbitrary",)),     # sequential hidden carry
    )(tokens, emb3, h0, w_fused, b_fused)

    hidden_new = outputs[S - 1].reshape(1, 1, H)
    return outputs, hidden_new


def reference_forward(tokens, hidden, emb_table, w_ih, w_hh, b_ih, b_hh):
    """Pure-JAX reference with PyTorch GRU semantics, stepped over tokens."""
    H = hidden.shape[-1]
    h = hidden.reshape(1, H)
    outs = []
    for t in range(tokens.shape[0]):
        x = emb_table[tokens[t]].reshape(1, H)
        gi = x @ w_ih.T + b_ih
        gh = h @ w_hh.T + b_hh
        r = jax.nn.sigmoid(gi[:, 0:H] + gh[:, 0:H])
        z = jax.nn.sigmoid(gi[:, H:2 * H] + gh[:, H:2 * H])
        n = jnp.tanh(gi[:, 2 * H:3 * H] + r * gh[:, 2 * H:3 * H])
        h = (1.0 - z) * n + z * h
        outs.append(h)
    return jnp.stack(outs, axis=0), h.reshape(1, 1, H)


if __name__ == "__main__":
    key = jax.random.PRNGKey(0)
    k_emb, k_wih, k_whh, k_bih, k_bhh, k_h, k_tok = jax.random.split(key, 7)

    H, V, S = HIDDEN, VOCAB, 8
    emb_table = jax.random.normal(k_emb, (V, H), dtype=jnp.float32) * 0.1
    w_ih = jax.random.normal(k_wih, (3 * H, H), dtype=jnp.float32) * 0.1
    w_hh = jax.random.normal(k_whh, (3 * H, H), dtype=jnp.float32) * 0.1
    b_ih = jax.random.normal(k_bih, (3 * H,), dtype=jnp.float32) * 0.1
    b_hh = jax.random.normal(k_bhh, (3 * H,), dtype=jnp.float32) * 0.1

    tokens = jax.random.randint(k_tok, (S,), 0, V, dtype=jnp.int32)
    hidden0 = jax.random.normal(k_h, (1, 1, H), dtype=jnp.float32) * 0.1

    # One-time parameter re-layout (outside jit).
    emb3, w_fused, b_fused = prepare_params(emb_table, w_ih, w_hh, b_ih, b_hh)

    # Full-sequence encode: S GRU steps inside one pallas_call.
    outs, hid = encoder_forward(tokens, hidden0, emb3, w_fused, b_fused)
    outs, hid = jax.block_until_ready((outs, hid))

    ref_outs, ref_hid = reference_forward(tokens, hidden0, emb_table,
                                          w_ih, w_hh, b_ih, b_hh)
    np.testing.assert_allclose(np.asarray(outs), np.asarray(ref_outs),
                               rtol=1e-5, atol=1e-5)
    np.testing.assert_allclose(np.asarray(hid), np.asarray(ref_hid),
                               rtol=1e-5, atol=1e-5)

    # Single-token call == exact Encoder.forward(x, hidden) semantics.
    out1, hid1 = encoder_forward(tokens[:1], hidden0, emb3, w_fused, b_fused)
    out1, hid1 = jax.block_until_ready((out1, hid1))
    ref_out1, ref_hid1 = reference_forward(tokens[:1], hidden0, emb_table,
                                           w_ih, w_hh, b_ih, b_hh)
    np.testing.assert_allclose(np.asarray(out1), np.asarray(ref_out1),
                               rtol=1e-5, atol=1e-5)
    np.testing.assert_allclose(np.asarray(hid1), np.asarray(ref_hid1),
                               rtol=1e-5, atol=1e-5)

    print("KERNEL_OK")
</pallas_src>

<mosaic_0001>
module attributes {stable_mosaic.version = 11 : i64} {
  func.func @gru_encoder_kernel(%arg0: i32, %arg1: memref<8xi32, #tpu.memory_space<smem>>, %arg2: memref<1x1x32xf32, #tpu.memory_space<vmem>>, %arg3: memref<1x32xf32, #tpu.memory_space<vmem>>, %arg4: memref<64x128xf32, #tpu.memory_space<vmem>>, %arg5: memref<1x128xf32, #tpu.memory_space<vmem>>, %arg6: memref<1x1x32xf32, #tpu.memory_space<vmem>>, %arg7: memref<1x32xf32, #tpu.memory_space<vmem>>) attributes {dimension_semantics = [#tpu.dimension_semantics<arbitrary>], iteration_bounds = array<i64: 8>, scalar_prefetch = 1 : i64, scratch_operands = 1 : i64, tpu.core_type = #tpu.core_type<tc>, window_params = [{transform_indices = @transform_0, window_bounds = array<i64: 1, 1, 32>}, {pipeline_mode = #tpu.pipeline_mode<synchronous>, transform_indices = @transform_1, window_bounds = array<i64: 1, 32>}, {pipeline_mode = #tpu.pipeline_mode<synchronous>, transform_indices = @transform_2, window_bounds = array<i64: 64, 128>}, {pipeline_mode = #tpu.pipeline_mode<synchronous>, transform_indices = @transform_3, window_bounds = array<i64: 1, 128>}, {transform_indices = @transform_4, window_bounds = array<i64: 1, 1, 32>}]} {
    %c0_i32 = arith.constant 0 : i32
    %0 = arith.cmpi eq, %arg0, %c0_i32 : i32
    %1 = arith.extui %0 : i1 to i32
    %c0_i32_0 = arith.constant 0 : i32
    %2 = arith.cmpi ne, %1, %c0_i32_0 : i32
    scf.if %2 {
      %c0_17 = arith.constant 0 : index
      %c0_18 = arith.constant 0 : index
      %37 = vector.load %arg3[%c0_17, %c0_18] : memref<1x32xf32, #tpu.memory_space<vmem>>, vector<1x32xf32>
      %c0_19 = arith.constant 0 : index
      %c0_20 = arith.constant 0 : index
      %38 = vector.load %arg7[%c0_19, %c0_20] : memref<1x32xf32, #tpu.memory_space<vmem>>, vector<1x32xf32>
      tpu.vector_store %arg7[%c0_19, %c0_20], %37 {strides = array<i32>} : memref<1x32xf32, #tpu.memory_space<vmem>>, vector<1x32xf32>,
    } else {
    }
    %c0 = arith.constant 0 : index
    %c0_1 = arith.constant 0 : index
    %c0_2 = arith.constant 0 : index
    %3 = vector.load %arg2[%c0, %c0_1, %c0_2] : memref<1x1x32xf32, #tpu.memory_space<vmem>>, vector<1x1x32xf32>
    %4 = vector.shape_cast %3 : vector<1x1x32xf32> to vector<1x32xf32>
    %c0_3 = arith.constant 0 : index
    %c0_4 = arith.constant 0 : index
    %5 = vector.load %arg7[%c0_3, %c0_4] : memref<1x32xf32, #tpu.memory_space<vmem>>, vector<1x32xf32>
    %6 = tpu.concatenate %4, %5 in 1 : vector<1x32xf32>, vector<1x32xf32> -> vector<1x64xf32>
    %c0_5 = arith.constant 0 : index
    %c0_6 = arith.constant 0 : index
    %7 = vector.load %arg4[%c0_5, %c0_6] : memref<64x128xf32, #tpu.memory_space<vmem>>, vector<64x128xf32>
    %cst = arith.constant dense<0.000000e+00> : vector<1x128xf32>
    %8 = tpu.matmul %6, %7, %cst {dimension_numbers = #tpu.dot_dimension_numbers<[1], [0], [0], [1], [0, 0, 1, 1], [], []>} : vector<1x64xf32>, vector<64x128xf32>, vector<1x128xf32> -> vector<1x128xf32>
    %c0_7 = arith.constant 0 : index
    %c0_8 = arith.constant 0 : index
    %9 = vector.load %arg5[%c0_7, %c0_8] : memref<1x128xf32, #tpu.memory_space<vmem>>, vector<1x128xf32>
    %10 = arith.addf %8, %9 : vector<1x128xf32>
    %11 = vector.extract_strided_slice %10 {offsets = [0, 0], sizes = [1, 32], strides = [1, 1]} : vector<1x128xf32> to vector<1x32xf32>
    %12 = arith.negf %11 : vector<1x32xf32>
    %13 = math.exp %12 : vector<1x32xf32>
    %cst_9 = arith.constant 1.000000e+00 : f32
    %14 = vector.broadcast %cst_9 : f32 to vector<1x32xf32>
    %15 = arith.addf %14, %13 : vector<1x32xf32>
    %16 = arith.divf %14, %15 : vector<1x32xf32>
    %17 = vector.extract_strided_slice %10 {offsets = [0, 32], sizes = [1, 32], strides = [1, 1]} : vector<1x128xf32> to vector<1x32xf32>
    %18 = arith.negf %17 : vector<1x32xf32>
    %19 = math.exp %18 : vector<1x32xf32>
    %cst_10 = arith.constant 1.000000e+00 : f32
    %20 = vector.broadcast %cst_10 : f32 to vector<1x32xf32>
    %21 = arith.addf %20, %19 : vector<1x32xf32>
    %22 = arith.divf %20, %21 : vector<1x32xf32>
    %23 = vector.extract_strided_slice %10 {offsets = [0, 64], sizes = [1, 32], strides = [1, 1]} : vector<1x128xf32> to vector<1x32xf32>
    %24 = vector.extract_strided_slice %10 {offsets = [0, 96], sizes = [1, 32], strides = [1, 1]} : vector<1x128xf32> to vector<1x32xf32>
    %25 = arith.mulf %16, %24 : vector<1x32xf32>
    %26 = arith.addf %23, %25 : vector<1x32xf32>
    %27 = math.tanh %26 : vector<1x32xf32>
    %cst_11 = arith.constant 1.000000e+00 : f32
    %28 = vector.broadcast %cst_11 : f32 to vector<1x32xf32>
    %29 = arith.subf %28, %22 : vector<1x32xf32>
    %30 = arith.mulf %29, %27 : vector<1x32xf32>
    %31 = arith.mulf %22, %5 : vector<1x32xf32>
    %32 = arith.addf %30, %31 : vector<1x32xf32>
    %c0_12 = arith.constant 0 : index
    %c0_13 = arith.constant 0 : index
    %33 = vector.load %arg7[%c0_12, %c0_13] : memref<1x32xf32, #tpu.memory_space<vmem>>, vector<1x32xf32>
    tpu.vector_store %arg7[%c0_12, %c0_13], %32 {strides = array<i32>} : memref<1x32xf32, #tpu.memory_space<vmem>>, vector<1x32xf32>,
    %c0_14 = arith.constant 0 : index
    %c0_15 = arith.constant 0 : index
    %c0_16 = arith.constant 0 : index
    %34 = vector.load %arg6[%c0_14, %c0_15, %c0_16] : memref<1x1x32xf32, #tpu.memory_space<vmem>>, vector<1x1x32xf32>
    %35 = vector.shape_cast %34 : vector<1x1x32xf32> to vector<1x32xf32>
    %36 = vector.shape_cast %32 : vector<1x32xf32> to vector<1x1x32xf32>
    tpu.vector_store %arg6[%c0_14, %c0_15, %c0_16], %36 {strides = array<i32>} : memref<1x1x32xf32, #tpu.memory_space<vmem>>, vector<1x1x32xf32>,
    return
  }
  func.func @transform_0(%arg0: i32, %arg1: memref<8xi32, #tpu.memory_space<smem>>) -> (i32, i32, i32) {
    %0 = arith.index_cast %arg0 : i32 to index
    %1 = memref.load %arg1[%0] : memref<8xi32, #tpu.memory_space<smem>>
    %c0_i32 = arith.constant 0 : i32
    %c0_i32_0 = arith.constant 0 : i32
    %c0_i32_1 = arith.constant 0 : i32
    return %1, %c0_i32, %c0_i32_0 : i32, i32, i32
  }
  func.func @transform_1(%arg0: i32, %arg1: memref<8xi32, #tpu.memory_space<smem>>) -> (i32, i32) {
    %c0_i32 = arith.constant 0 : i32
    %c0_i32_0 = arith.constant 0 : i32
    %c0_i32_1 = arith.constant 0 : i32
    return %c0_i32, %c0_i32_0 : i32, i32
  }
  func.func @transform_2(%arg0: i32, %arg1: memref<8xi32, #tpu.memory_space<smem>>) -> (i32, i32) {
    %c0_i32 = arith.constant 0 : i32
    %c0_i32_0 = arith.constant 0 : i32
    %c0_i32_1 = arith.constant 0 : i32
    return %c0_i32, %c0_i32_0 : i32, i32
  }
  func.func @transform_3(%arg0: i32, %arg1: memref<8xi32, #tpu.memory_space<smem>>) -> (i32, i32) {
    %c0_i32 = arith.constant 0 : i32
    %c0_i32_0 = arith.constant 0 : i32
    %c0_i32_1 = arith.constant 0 : i32
    return %c0_i32, %c0_i32_0 : i32, i32
  }
  func.func @transform_4(%arg0: i32, %arg1: memref<8xi32, #tpu.memory_space<smem>>) -> (i32, i32, i32) {
    %c0_i32 = arith.constant 0 : i32
    %c0_i32_0 = arith.constant 0 : i32
    %c0_i32_1 = arith.constant 0 : i32
    return %arg0, %c0_i32, %c0_i32_0 : i32, i32, i32
  }
}

</mosaic_0001>

<bundles_post_ra>
// kernel: encoder_forward.1
= control target key start
LH: loop header
LB: loop body
LE: loop exit
PB: predicated region body
PF: predicated region fallthrough
CT: control target
= control target key end

     0   :  { %s833_s0 = inlined_call_operand.vmem [shape: s32[8], index: 0, kind: input, shape index: {}]   ;;  %s834_s1 = inlined_call_operand.hbm [shape: f32[16,1,32], index: 1, kind: input, shape index: {}]   ;;  %s835_s2 = inlined_call_operand.vmem [shape: f32[1,32], index: 2, kind: input, shape index: {}]   ;;  %s836_s3 = inlined_call_operand.hbm [shape: f32[64,128], index: 3, kind: input, shape index: {}]   ;;  %s837_s4 = inlined_call_operand.vmem [shape: f32[1,128], index: 4, kind: input, shape index: {}]   ;;  %s838_s5 = inlined_call_operand.vmem [shape: f32[8,1,32], index: 5, kind: output, shape index: {}]  }
   0x1   :  { %s10_s20 = sshll.u32 %s833_s0, 4  ;;  %s11_s20 = int_to_ptr.vmem [resolvable:$true] %s10_s20 }
   0x2   :  { %s543_s21 = scalar_lea.vmem %s11_s20, 16  ;;  %p548_p1 = scmp.lt.s32.totalorder %s11_s20, %s11_s20 }
   0x3   :  { %p544_p0 = scmp.ne.s32.totalorder %s11_s20, %s543_s21  ;;  %p549_p2 = scmp.lt.s32.totalorder %s543_s21, %s543_s21 }
   0x5   :  { %p550_p3 = por %p549_p2, %p548_p1 }
   0x7   :  { %p551_p4 = pnand %p550_p3, %p544_p0 }
   0x9   :  { %554 = shalt.err (!%p551_p4)  }
   0xa   :  { %s651_s22 = smov [#allocation4]  }
   0xb   :  { %13 = dma.vmem_to_smem %s11_s20, 16, %s651_s22, [#allocation3] }
   0xc   :  { %625 = dma.done.wait [#allocation3], 16 }
   0xd   :  { %626 = vsyncadd [#allocation3], 4294967280 }
   0xe   :  { %15 = sfence }
   0xf   :  { %16 = vsyncpa [#allocation6], 0 }
  0x10   :  { %18 = vsyncpa [#allocation6 + $0x1], 0 }
  0x11   :  { %19 = vsyncpa [#allocation8], 0  ;;  %s694_s23 = smov 0   ;;  %s696_s24 = smov 0  }
  0x12   :  { %s698_s0 = smov 0   ;;  %s700_s25 = smov 0  }
  0x13 LB: > { %s713_s26 = sadd.s32 4294967295, %s649_s25   ;;  %p47_p5 = scmp.ne.s32.totalorder %s641_s24, %s637_s23  ;;  %s649_s25 = sphi %s700_s25, %s854_s25   ;;  %s645_s0 = sphi %s698_s0, %s853_s0   ;;  %s641_s24 = sphi %s696_s24, %s852_s24   ;;  %s637_s23 = sphi %s694_s23, %s851_s23  }
  0x14   : > { %p839_p6 = scmp.eq.s32.totalorder %s713_s26, 0  ;;  %p435_p7 = scmp.ge.s32.totalorder %s649_s25, 1 }
  0x15   : > { %p147_p8 = scmp.lt.s32.totalorder %s649_s25, 9  ;;  %s652_s29 = smov [#allocation7]  }
  0x16   : > { %p722_p10 = por %p839_p6, %p47_p5  ;;  %s162_s30 = sshll.u32 %s652_s29, 4  ;;  %s163_s30 = int_to_ptr.vmem [resolvable:$true] %s162_s30 }
  0x17   : > { %p726_p11 = pnand %p435_p7, %p147_p8  ;;  %s739_s7 = sadd.s32 1, %s649_s25  }
  0x18   : > { %s842_s27 = scalar_select %p722_p10, 1, 0 }
  0x19   : > { %s843_s28 = scalar_select %p726_p11, 1, 0 }
  0x1a   : > { %p483_p12 = pneg %p726_p11  ;;  %s29_s8 = sld [smem:[#allocation4 + %s649_s25]] }
  0x1b   : > { %s30_s9 = sld [smem:[#allocation4 + %s739_s7]]  ;;  %s566_s10 = scalar_lea.vmem %s163_s30, 1024 }
  0x1c   : > { %p734_p13 = pnand %p483_p12, %p839_p6  ;;  %p567_p1 = scmp.ne.s32.totalorder %s163_s30, %s566_s10 }
  0x1d   : > { %p574_p4 = scmp.lt.s32.totalorder %s163_s30, %s163_s30  ;;  %p575_p5 = scmp.lt.s32.totalorder %s566_s10, %s566_s10 }
  0x1e   : > { %p557_p0 = pneg %p734_p13 }
  0x1f   : > { %p576_p7 = por %p575_p5, %p574_p4 }
  0x20   : > { %p569_p2 = pnand %p567_p1, %p557_p0 }
  0x22   : > { %p570_p3 = pneg %p569_p2 }
  0x24   : > { %p577_p8 = pnand %p576_p7, %p570_p3 }
  0x26   : > { %580 = shalt.err (!%p577_p8)
}
  0x27   : > { %s653_s11 = smov 128   ;;  %s654_s12 = smov 8  }
  0x28   : > { %486 = dma.hbm_to_vmem [thread:$0]  (!%p734_p13), %s836_s3, 1024, %s163_s30, [#allocation8], %s653_s11, %s653_s11, %s654_s12  }
  0x29   : > { %p41_p12 = scmp.ne.s32.totalorder %s645_s0, %s641_s24  ;;  %p42_p0 = scmp.eq.s32.totalorder %s649_s25, 0 }
  0x2a   : > { %s34_s15 = sadd.s32 1, %s645_s0  ;;  %s31_s16 = ssub.s32 %s29_s8, %s30_s9 }
  0x2b   : > { %p43_p1 = por %p42_p0, %p41_p12  ;;  %p494_p2 = scmp.lt.s32.totalorder %s649_s25, 8 }
  0x2c   : > { %p32_p3 = scmp.eq.s32.totalorder %s31_s16, 0  ;;  %s179_s17 = sand.u32 1, %s645_s0  }
  0x2d   : > { %s477_s18 = scalar_select %p43_p1, [#allocation4], [#allocation9] }
  0x2e   : > { %s757_s19 = scalar_select %p32_p3, %s645_s0, %s34_s15  }
  0x2f   : > { %s856_s25 = smov (!%p43_p1, %s649_s25), 0  ;;  %s858_s18 = smov (!%p494_p2, %s477_s18), [#allocation10] }
  0x30   : > { %s860_s25 = smov (!%p494_p2, %s856_s25), 0  ;;  %p760_p4 = pnand %p494_p2, %p43_p1 }
  0x31   : > { %s183_s21 = sld [smem:[%s858_s18 + %s860_s25]]  ;;  %s182_s22 = scalar_lea.vmem [#allocation5], %s179_s17 }
  0x32   : > { %s190_s23 = sshll.u32 %s182_s22, 4  ;;  %s180_s9 = scalar_lea.sflag [#allocation6], %s179_s17  ;;  %s764_s23 = int_to_ptr.vmem [resolvable:$true] %s190_s23 }
  0x33   : > { %p583_p5 = pneg %p760_p4  ;;  %s586_s25 = scalar_lea.hbm %s834_s1, 256 }
  0x37   : > { %s438_s29 = sshll.u32 %s183_s21, 4 }
  0x38   : > { %s188_s8 = scalar_lea.hbm %s834_s1, %s438_s29 }
  0x39   : > { %s581_s10 = scalar_lea.hbm %s188_s8, 16  ;;  %p587_p12 = scmp.lt.s32.totalorder %s188_s8, %s834_s1 }
  0x3a   : > { %p582_p13 = scmp.ne.s32.totalorder %s188_s8, %s581_s10  ;;  %p588_p0 = scmp.lt.s32.totalorder %s586_s25, %s581_s10 }
  0x3c   : > { %p584_p7 = pnand %p583_p5, %p582_p13  ;;  %p589_p1 = por %p588_p0, %p587_p12 }
  0x3e   : > { %p585_p8 = pneg %p584_p7 }
  0x40   : > { %p590_p2 = pnand %p589_p1, %p585_p8 }
  0x42   : > { %593 = shalt.err (!%p590_p2)
}
  0x43   : > { %s594_s15 = scalar_lea.vmem %s764_s23, 16  ;;  %s655_s16 = smov [#allocation5]  }
  0x44   : > { %p595_p3 = scmp.ne.s32.totalorder %s764_s23, %s594_s15  ;;  %s599_s17 = sshll.u32 %s655_s16, 4  ;;  %s600_s17 = int_to_ptr.vmem [resolvable:$false] %s599_s17 }
  0x45   : > { %s601_s18 = scalar_lea.vmem %s600_s17, 32  ;;  %p602_p7 = scmp.lt.s32.totalorder %s764_s23, %s600_s17 }
  0x46   : > { %p597_p9 = pnand %p595_p3, %p583_p5  ;;  %p603_p6 = scmp.lt.s32.totalorder %s601_s18, %s594_s15 }
  0x48   : > { %p598_p13 = pneg %p597_p9  ;;  %p604_p10 = por %p603_p6, %p602_p7 }
  0x4a   : > { %p605_p11 = pnand %p604_p10, %p598_p13 }
  0x4c   : > { %608 = shalt.err (!%p605_p11)
}
  0x4d   : > { %492 = dma.hbm_to_vmem [thread:$0]  (!%p760_p4), %s188_s8, 16, %s764_s23, %s180_s9  }
  0x4e   : > { %p846_p8 = scmp.ne.s32.totalorder %s843_s28, 0 }
  0x4f   : > { %s201_s21 = sand.u32 (!%p846_p8), 1, %s641_s24   ;;  %p847_p9 = scmp.ne.s32.totalorder (!%p846_p8), %s842_s27, 0 }
  0x50   : > { %199 = sbr.rel (%p846_p8) target bundleno = 900 (0x384), region = 36  ;;  %s202_s22 = scalar_lea.sflag (!%p846_p8), [#allocation6], %s201_s21 }
  0x51   : > { %s786_s29 = scalar_lea.vmem (!%p846_p8), [#allocation5], %s201_s21 }
  0x55   : > { %628 = dma.done.wait (%p847_p9), %s202_s22, 16  }
  0x56   : > { %630 = vsyncadd (%p847_p9), %s202_s22, 4294967280  ;;  %p848_p6 = scmp.eq.s32.totalorder %s713_s26, 0 }
  0x58   : > { %632 = dma.done.wait (%p848_p6), [#allocation8], 1024   ;;  %p849_p10 = pmov %p848_p6 }
  0x59   : > { %p231_p11 = scmp.lt.s32.totalorder %s713_s26, 7  ;;  %p850_p4 = scmp.ne.s32.totalorder %s713_s26, 0 }
  0x5a   : > { %634 = vsyncadd (%p849_p10), [#allocation8], 4294966272 }
  0x5b   : > { %s798_s28 = scalar_select %p231_p11, %s713_s26, 7 }
  0x5c   : > { %237 = sbr.rel (%p850_p4) target bundleno = 99 (0x63), region = 48 }
  0x5d   : > { %s233_s30 = scalar_lea.vmem %s838_s5, %s798_s28 }
  0x61   : > { %v238_v0 = vld [vmem:[%s835_s2] sm:$0x1]  ;;  %vm239_vm0 = vcmask 253952  }
  0x62   : > { %240 = vst.msk [vmem:[#allocation2] sm:$0x1] %vm239_vm0, %v238_v0 }
  0x63 PF: > { %v260_v2 = vld [vmem:[#allocation7 + $0x38] sm:$0xff]  ;;  %s656_s8 = smov 32   ;;  %v657_v3 = vmov 0.0   ;;  %v259_v4 = vld [vmem:[#allocation7 + $0x30] sm:$0xff]  ;;  %vm658_vm1 = vmmov 0   ;;  %v258_v5 = vld [vmem:[#allocation7 + $0x28] sm:$0xff] }
  0x64   : > { %456 = vmatprep.subr.mxu0 %v657_v3  ;;  %472 = vmatprep.mubr.msk.f32.mxu0 %vm658_vm1, %v657_v3  ;;  %v257_v6 = vld [vmem:[#allocation7 + $0x20] sm:$0xff]  ;;  %v256_v7 = vld [vmem:[#allocation7 + $0x18] sm:$0xff]  ;;  %v255_v8 = vld [vmem:[#allocation7 + $0x10] sm:$0xff]  ;;  %vm251_vm2 = vcmask 261120   ;;  %vm262_vm3 = vcmask 523264   ;;  %s659_s10 = smov 64  }
  0x65   : > { %457 = vmatpush3.msra.mxu0 %v260_v2  ;;  %v254_v9 = vld [vmem:[#allocation7 + $0x8] sm:$0xff]  ;;  %v253_v10 = vld [vmem:[#allocation7] sm:$0xff]  ;;  %v241_v11 = vld [vmem:[%s786_s29] sm:$0x1]  ;;  %s660_s11 = smov 96   ;;  %vm365_vm4 = vcmask 253952  }
  0x66   : > { %458 = vmatprep.subr.mxu0 %v657_v3  ;;  %v261_v14 = vld [vmem:[%s837_s4] sm:$0x1] }
  0x67   : > { %459 = vmatpush3.msra.mxu0 %v259_v4 }
  0x68   : > { %460 = vmatprep.subr.mxu0 %v657_v3 }
  0x69   : > { %v442_v1 = vld [vmem:[#allocation2] ss:$0 sm:$0xff]  ;;  %461 = vmatpush3.msra.mxu0 %v258_v5 }
  0x6a   : > { %248 = vrot.lane.b32.xlu0 %v442_v1, %s656_s8  ;;  %462 = vmatprep.subr.mxu0 %v657_v3 }
  0x6b   : > { %463 = vmatpush3.msra.mxu0 %v257_v6 }
  0x6c   : > { %464 = vmatprep.subr.mxu0 %v657_v3 }
  0x6d   : > { %465 = vmatpush3.msra.mxu0 %v256_v7 }
  0x6e   : > { %466 = vmatprep.subr.mxu0 %v657_v3 }
  0x6f   : > { %467 = vmatpush3.msra.mxu0 %v255_v8 }
  0x70   : > { %468 = vmatprep.subr.mxu0 %v657_v3 }
  0x71   : > { %469 = vmatpush3.msra.mxu0 %v254_v9 }
  0x72   : > { %470 = vmatprep.subr.mxu0 %v657_v3 }
  0x73   : > { %471 = vmatpush3.msra.mxu0 %v253_v10 }
  0xdc   : > { %v249_v12 = vpop.permute.xlu0 %248 }
  0xdd   : > { %v252_v13 = vsel %vm251_vm2, %v241_v11, %v249_v12 }
  0xde   : > { %473 = vmatmul.mubr.msk.f32.vlgmr.msra.gmra.mxu0 %vm262_vm3, %v252_v13 }
 0x19e   : > { %v332_v15 = vpop.f32.mrf.mxu0 }
 0x19f   : > { %v333_v16 = vadd.f32 %v332_v15, %v261_v14 }
 0x1a0   : > { %v474_v17 = vpop.f32.mrf.mxu0 }
 0x1a1   : > { %343 = vrot.lane.b32.xlu0 %v333_v16, %s656_s8  ;;  %v444_v18 = vmul.f32 -1.442695, %v333_v16 }
 0x1a3   : > { %537 = vpow2.f32 %v444_v18 }
 0x1b0   : > { %v538_v19 = vpop.eup %537 }
 0x1b1   : > { %v339_v20 = vadd.f32 1.0, %v538_v19 }
 0x1b3   : > { %539 = vrcp.f32 %v339_v20 }
 0x1c0   : > { %v540_v21 = vpop.eup %539 }
 0x1c1   : > { %v353_v27 = vsub.f32 1.0, %v540_v21  ;;  %v359_v29 = vmul.f32 %v540_v21, %v249_v12 }
 0x213   : > { %v344_v22 = vpop.permute.xlu0 %343 }
 0x214   : > { %v346_v23 = vmul.f32 %v540_v21, %v344_v22 }
 0x216   : > { %348 = vrot.lane.b32.xlu1 %v346_v23, %s659_s10 }
 0x288   : > { %v349_v24 = vpop.permute.xlu1 %348 }
 0x289   : > { %v351_v25 = vadd.f32 %v349_v24, %v333_v16 }
 0x28b   : > { %541 = vtanh.f32 %v351_v25 }
 0x298   : > { %v542_v26 = vpop.eup %541 }
 0x299   : > { %355 = vrot.lane.b32.xlu1 %v542_v26, %s660_s11 }
 0x30b   : > { %v356_v28 = vpop.permute.xlu1 %355 }
 0x30c   : > { %v358_v30 = vmul.f32 %v356_v28, %v353_v27 }
 0x30e   : > { %v360_v31 = vadd.f32 %v359_v29, %v358_v30 }
 0x310   : > { %362 = vrot.lane.b32.xlu0 %v360_v31, %s660_s11 }
 0x382   : > { %v363_v32 = vpop.permute.xlu0 %362 }
 0x383   : > { %366 = vst.msk [vmem:[#allocation2] sm:$0x1] %vm365_vm4, %v363_v32  ;;  %367 = vst.msk [vmem:[%s233_s30] sm:$0x1] %vm365_vm4, %v363_v32 }
 0x384 PF: > { %p22_p5 = scmp.ge.s32.totalorder %s739_s7, 10   ;;  %s851_s23 = smov %s641_s24 }
 0x385   : > { %s852_s24 = smov %s645_s0  ;;  %s853_s0 = smov %s757_s19 }
 0x386   : > { %s854_s25 = smov %s739_s7  ;;  %24 = sbr.rel (!%p22_p5) target bundleno = 19 (0x13), region = 84 }
 0x38b   :  { %385 = vsyncpa [#allocation6], 1 }
 0x38c   :  { %387 = vsyncpa [#allocation6 + $0x1], 1 }
 0x38d   :  { %388 = vsyncpa [#allocation8], 1 }

</bundles_post_ra>
